<compile_context>
chip_gen: v7x
topology: tpu7x:2x2x1
jax: 0.10.0
libtpu: 0.0.40
codegen_flags: <defaults>
</compile_context>

<pallas_src>
import functools

import jax
import jax.numpy as jnp
from jax import lax
from jax.experimental import pallas as pl
from jax.experimental.pallas import tpu as pltpu


def _cdiv(a, b):
    return -(-a // b)


def _round_up(x, m):
    return _cdiv(x, m) * m


# ---------------------------------------------------------------------------
# Pallas kernel: (im2col-)GEMM on the MXU + bias / ReLU / LAB epilogue.
#   grid = (M_tiles,)          -> single-K kernel (no scratch)
#   grid = (M_tiles, K_tiles)  -> f32 accumulator scratch, epilogue at last K
# ---------------------------------------------------------------------------
def _conv_gemm_kernel(*refs, multi_k, use_act, use_lab):
    x_ref, w_ref, bias_ref = refs[0], refs[1], refs[2]
    pos = 3
    lab_ref = None
    if use_lab:
        lab_ref = refs[pos]
        pos += 1
    o_ref = refs[pos]
    acc_ref = refs[pos + 1] if multi_k else None

    # bf16 x bf16 on the MXU, f32 accumulation.
    part = jnp.dot(x_ref[...], w_ref[...], preferred_element_type=jnp.float32)

    def _epilogue(acc):
        y = acc + bias_ref[...]            # folded-BN bias (scale already in w)
        if use_act:
            y = jnp.maximum(y, 0.0)        # ReLU
            if use_lab:                    # LearnableAffineBlock (SMEM scalars)
                y = y * lab_ref[0] + lab_ref[1]
        o_ref[...] = y.astype(o_ref.dtype)

    if not multi_k:
        _epilogue(part)
    else:
        kk = pl.program_id(1)

        @pl.when(kk == 0)
        def _():
            acc_ref[...] = part

        @pl.when(kk != 0)
        def _():
            acc_ref[...] += part

        @pl.when(kk == pl.num_programs(1) - 1)
        def _():
            _epilogue(acc_ref[...])


# ---------------------------------------------------------------------------
# ConvBNAct forward (NHWC activations, HWIO weights)
# ---------------------------------------------------------------------------
def conv_bn_act(x, params, *, kernel_size, stride=1, groups=1, padding="",
                use_act=True, use_lab=False, out_padded=False, block_m=512):
    """Fused ConvBNAct. `x` is NHWC; its channel dim may already be 128-padded
    (extra channels are matched with zero weight rows)."""
    assert groups == 1, "TODO(synk): grouped conv not implemented"
    w = params["w"]
    kh, kw, cin, cout = w.shape
    assert kh == kernel_size and kw == kernel_size
    b = x.shape[0]
    cin_in = x.shape[-1]
    assert cin_in >= cin

    # --- weights / epilogue constants (tiny tensors, wrapper-side) ----------
    cout_p = _round_up(cout, 128)                 # lane-dense stores, full MXU N
    # Fold BN scale into the conv weights; epilogue keeps only `+ bias`.
    wf = (w.astype(jnp.float32)
          * params["scale"].astype(jnp.float32)[None, None, None, :])
    if cin_in > cin:                              # accept channel-padded inputs
        wf = jnp.pad(wf, ((0, 0), (0, 0), (0, cin_in - cin), (0, 0)))
    bias = jnp.pad(params["bias"].astype(jnp.float32), (0, cout_p - cout))
    bias = bias.reshape(1, cout_p)

    # --- spatial padding (PyTorch semantics); bf16 BEFORE any data movement --
    xb = x.astype(jnp.bfloat16)
    if padding == "same":                         # nn.ZeroPad2d([0, 1, 0, 1])
        xb = jnp.pad(xb, ((0, 0), (0, 1), (0, 1), (0, 0)))
    else:                                         # padding = (k - 1) // 2
        p = (kernel_size - 1) // 2
        if p > 0:
            xb = jnp.pad(xb, ((0, 0), (p, p), (p, p), (0, 0)))
    hp, wp = xb.shape[1], xb.shape[2]
    ho = (hp - kh) // stride + 1
    wo = (wp - kw) // stride + 1
    m = b * ho * wo
    k_raw = kh * kw * cin_in

    # --- tiling: generation-aware VMEM budget; tile K, never collapse TM -----
    try:
        vmem_cap = int(pltpu.get_tpu_info().vmem_capacity_bytes)
    except Exception:
        vmem_cap = 64 * 1024 * 1024               # conservative (v7x) fallback
    budget = (vmem_cap * 2) // 5                  # ~40% of VMEM for working set

    def _est(tm_, tk_):                           # double-buffered working set
        return (2 * (tm_ * tk_ * 2 + tk_ * cout_p * 2 + tm_ * cout_p * 2
                     + cout_p * 4)
                + tm_ * cout_p * 4 + (1 << 20))

    tm = max(16, _round_up(min(block_m, m), 16))
    if m <= tm and m > 16:
        # >= 2 M-tiles whenever possible so both v7x TensorCores get work.
        tm = max(16, _round_up(_cdiv(m, 2), 16))

    nk, tk = 1, k_raw
    while _est(tm, tk) > budget and tk > 512:     # tile K before touching TM
        nk *= 2
        tk = _round_up(_cdiv(k_raw, nk), 128)
    nk = _cdiv(k_raw, tk)
    k_p = tk * nk if nk > 1 else k_raw
    while _est(tm, tk) > budget and tm > 256:     # last resort; never below 256
        tm = max(256, _round_up(tm // 2, 16))
    nm = _cdiv(m, tm)

    # --- LHS (bf16) -----------------------------------------------------------
    if kh == 1 and kw == 1:
        # 1x1 conv: no im2col at all (stride == 1 is a free reshape).
        if stride > 1:
            xb = xb[:, 0:(ho - 1) * stride + 1:stride,
                       0:(wo - 1) * stride + 1:stride, :]
        lhs = xb.reshape(m, k_raw)
        if k_p > k_raw:
            lhs = jnp.pad(lhs, ((0, 0), (0, k_p - k_raw)))
    else:
        # TODO(synk): replace with in-kernel patch extraction from halo'd NHWC
        # row tiles (Element/offset index_maps or manual DMA) to remove this
        # kh*kw-inflated bf16 intermediate entirely.
        slabs = []
        for ih in range(kh):
            for iw in range(kw):
                slabs.append(xb[:, ih:ih + (ho - 1) * stride + 1:stride,
                                   iw:iw + (wo - 1) * stride + 1:stride, :])
        if k_p > k_raw:                           # fold K padding into the concat
            slabs.append(jnp.zeros((b, ho, wo, k_p - k_raw), jnp.bfloat16))
        lhs = jnp.concatenate(slabs, axis=-1).reshape(m, k_p)

    wm = wf.reshape(kh * kw * cin_in, cout)
    wm = jnp.pad(wm, ((0, k_p - k_raw), (0, cout_p - cout))).astype(jnp.bfloat16)

    # --- pallas_call -----------------------------------------------------------
    apply_lab = bool(use_act and use_lab)
    multi_k = nk > 1
    if multi_k:
        grid = (nm, nk)
        x_spec = pl.BlockSpec((tm, tk), lambda i, kk_: (i, kk_))
        w_spec = pl.BlockSpec((tk, cout_p), lambda i, kk_: (kk_, 0))
        b_spec = pl.BlockSpec((1, cout_p), lambda i, kk_: (0, 0))
        o_spec = pl.BlockSpec((tm, cout_p), lambda i, kk_: (i, 0))
        semantics = ("parallel", "arbitrary")
        scratch = [pltpu.VMEM((tm, cout_p), jnp.float32)]
    else:
        grid = (nm,)
        x_spec = pl.BlockSpec((tm, k_p), lambda i: (i, 0))
        w_spec = pl.BlockSpec((k_p, cout_p), lambda i: (0, 0))
        b_spec = pl.BlockSpec((1, cout_p), lambda i: (0, 0))
        o_spec = pl.BlockSpec((tm, cout_p), lambda i: (i, 0))
        semantics = ("parallel",)
        scratch = []
    # TODO(synk): pipeline_mode=pl.Buffered(1) on the constant-index weight /
    # bias specs would halve their resident VMEM (v7x headroom).

    in_specs = [x_spec, w_spec, b_spec]
    inputs = [lhs, wm, bias]
    if apply_lab:
        lab = jnp.concatenate(
            [params["lab_scale"].reshape(1),
             params["lab_bias"].reshape(1)]).astype(jnp.float32)
        in_specs.append(pl.BlockSpec(memory_space=pltpu.MemorySpace.SMEM))
        inputs.append(lab)

    vmem_limit = int(min(max(3 * _est(tm, tk) // 2, 32 * 1024 * 1024),
                         (vmem_cap * 3) // 4))
    cost = pl.CostEstimate(
        flops=2 * m * k_p * cout_p, transcendentals=0,
        bytes_accessed=lhs.size * 2 + wm.size * 2 + m * cout_p * 2)

    out = pl.pallas_call(
        functools.partial(_conv_gemm_kernel, multi_k=multi_k,
                          use_act=use_act, use_lab=apply_lab),
        out_shape=jax.ShapeDtypeStruct((m, cout_p), jnp.bfloat16),
        grid=grid,
        in_specs=in_specs,
        out_specs=o_spec,
        scratch_shapes=scratch,
        compiler_params=pltpu.CompilerParams(
            dimension_semantics=semantics, vmem_limit_bytes=vmem_limit),
        cost_estimate=cost,
    )(*inputs)

    if out_padded:
        # Keep the 128-padded-Cout bf16 layout flowing into the next layer.
        return out.reshape(b, ho, wo, cout_p)
    return out[:, :cout].reshape(b, ho, wo, cout)


# ---------------------------------------------------------------------------
# Plain-JAX reference with the same rounding points (scale folded before the
# bf16 cast, bf16 operands, f32 math, bf16 output) for correctness checking.
# ---------------------------------------------------------------------------
def conv_bn_act_reference(x, params, *, kernel_size, stride=1, padding="",
                          use_act=True, use_lab=False):
    wf = params["w"].astype(jnp.float32) * params["scale"][None, None, None, :]
    wb = wf.astype(jnp.bfloat16).astype(jnp.float32)
    xb = x.astype(jnp.bfloat16).astype(jnp.float32)
    if padding == "same":
        pad = [(0, 1), (0, 1)]
    else:
        p = (kernel_size - 1) // 2
        pad = [(p, p), (p, p)]
    y = lax.conv_general_dilated(
        xb, wb, window_strides=(stride, stride), padding=pad,
        dimension_numbers=("NHWC", "HWIO", "NHWC"))
    y = y + params["bias"][None, None, None, :]
    if use_act:
        y = jnp.maximum(y, 0.0)
        if use_lab:
            y = y * params["lab_scale"][0] + params["lab_bias"][0]
    return y.astype(jnp.bfloat16).astype(jnp.float32)


# ---------------------------------------------------------------------------
# Deterministic synthetic parameters (BN folded to per-channel affine)
# ---------------------------------------------------------------------------
def init_conv_bn_act_params(key, cin, cout, ksize, *, use_lab=False):
    kw_, kg, kb, km, kv, kls, klb = jax.random.split(key, 7)
    w = jax.random.normal(kw_, (ksize, ksize, cin, cout), jnp.float32) * 0.1
    gamma = jax.random.uniform(kg, (cout,), jnp.float32, 0.8, 1.2)
    beta = jax.random.normal(kb, (cout,), jnp.float32) * 0.1
    mean = jax.random.normal(km, (cout,), jnp.float32) * 0.1
    var = jax.random.uniform(kv, (cout,), jnp.float32, 0.5, 1.5)
    eps = 1e-5
    scale = gamma / jnp.sqrt(var + eps)   # folded inference-mode BatchNorm
    bias = beta - mean * scale
    p = {"w": w, "scale": scale, "bias": bias}
    if use_lab:
        p["lab_scale"] = 1.0 + 0.1 * jax.random.normal(kls, (1,), jnp.float32)
        p["lab_bias"] = 0.1 * jax.random.normal(klb, (1,), jnp.float32)
    return p


if __name__ == "__main__":
    key = jax.random.PRNGKey(0)
    B, C_IN, H, W = 2, 4, 16, 16
    C1, C2 = 16, 32

    kx, k1, k2 = jax.random.split(key, 3)
    x_nchw = jax.random.normal(kx, (B, C_IN, H, W), jnp.float32)   # PyTorch NCHW
    x = jnp.transpose(x_nchw, (0, 2, 3, 1))                        # -> NHWC

    p1 = init_conv_bn_act_params(k1, C_IN, C1, 3, use_lab=False)
    p2 = init_conv_bn_act_params(k2, C1, C2, 2, use_lab=True)

    # ConvBNAct(4, 16, kernel_size=3, stride=2): padded bf16 output feeds layer2.
    layer1 = jax.jit(functools.partial(conv_bn_act, kernel_size=3, stride=2,
                                       padding="", use_act=True, use_lab=False,
                                       out_padded=True))
    # ConvBNAct(16, 32, kernel_size=2, stride=1, padding='same', use_lab=True)
    layer2 = jax.jit(functools.partial(conv_bn_act, kernel_size=2, stride=1,
                                       padding="same", use_act=True,
                                       use_lab=True, out_padded=False))

    y1p = jax.block_until_ready(layer1(x, p1))     # (2, 8, 8, 128) bf16, padded
    y2 = jax.block_until_ready(layer2(y1p, p2))    # (2, 8, 8, 32)  bf16

    assert y1p.shape == (B, H // 2, W // 2, 128), y1p.shape
    y1 = y1p[..., :C1]
    assert y1.shape == (B, H // 2, W // 2, C1), y1.shape
    assert y2.shape == (B, H // 2, W // 2, C2), y2.shape

    # Correctness vs a plain-JAX reference with matched rounding points.
    r1 = conv_bn_act_reference(x, p1, kernel_size=3, stride=2, padding="",
                               use_act=True, use_lab=False)
    r2 = conv_bn_act_reference(y1.astype(jnp.float32), p2, kernel_size=2,
                               stride=1, padding="same", use_act=True,
                               use_lab=True)
    err1 = float(jnp.abs(y1.astype(jnp.float32) - r1).max())
    err2 = float(jnp.abs(y2.astype(jnp.float32) - r2).max())
    assert jnp.allclose(y1.astype(jnp.float32), r1, atol=2e-2, rtol=2e-2), err1
    assert jnp.allclose(y2.astype(jnp.float32), r2, atol=2e-2, rtol=2e-2), err2

    print("KERNEL_OK")
</pallas_src>

<mosaic_0001>
module attributes {stable_mosaic.version = 11 : i64} {
  func.func @_conv_gemm_kernel(%arg0: i32, %arg1: memref<64x36xbf16, #tpu.memory_space<vmem>>, %arg2: memref<36x128xbf16, #tpu.memory_space<vmem>>, %arg3: memref<1x128xf32, #tpu.memory_space<vmem>>, %arg4: memref<64x128xbf16, #tpu.memory_space<vmem>>) attributes {dimension_semantics = [#tpu.dimension_semantics<parallel>], iteration_bounds = array<i64: 2>, scalar_prefetch = 0 : i64, scratch_operands = 0 : i64, tpu.core_type = #tpu.core_type<tc>, window_params = [{transform_indices = @transform_0, window_bounds = array<i64: 64, 36>}, {pipeline_mode = #tpu.pipeline_mode<synchronous>, transform_indices = @transform_1, window_bounds = array<i64: 36, 128>}, {pipeline_mode = #tpu.pipeline_mode<synchronous>, transform_indices = @transform_2, window_bounds = array<i64: 1, 128>}, {transform_indices = @transform_3, window_bounds = array<i64: 64, 128>}]} {
    %c0 = arith.constant 0 : index
    %c0_0 = arith.constant 0 : index
    %0 = vector.load %arg1[%c0, %c0_0] : memref<64x36xbf16, #tpu.memory_space<vmem>>, vector<64x36xbf16>
    %c0_1 = arith.constant 0 : index
    %c0_2 = arith.constant 0 : index
    %1 = vector.load %arg2[%c0_1, %c0_2] : memref<36x128xbf16, #tpu.memory_space<vmem>>, vector<36x128xbf16>
    %cst = arith.constant dense<0.000000e+00> : vector<64x128xf32>
    %2 = tpu.matmul %0, %1, %cst {dimension_numbers = #tpu.dot_dimension_numbers<[1], [0], [0], [1], [0, 0, 1, 1], [], []>} : vector<64x36xbf16>, vector<36x128xbf16>, vector<64x128xf32> -> vector<64x128xf32>
    %c0_3 = arith.constant 0 : index
    %c0_4 = arith.constant 0 : index
    %3 = vector.load %arg3[%c0_3, %c0_4] : memref<1x128xf32, #tpu.memory_space<vmem>>, vector<1x128xf32>
    %4 = vector.broadcast %3 : vector<1x128xf32> to vector<64x128xf32>
    %5 = arith.addf %2, %4 : vector<64x128xf32>
    %cst_5 = arith.constant 0.000000e+00 : f32
    %6 = vector.broadcast %cst_5 : f32 to vector<64x128xf32>
    %7 = arith.maximumf %5, %6 : vector<64x128xf32>
    %8 = arith.truncf %7 : vector<64x128xf32> to vector<64x128xbf16>
    %c0_6 = arith.constant 0 : index
    %c0_7 = arith.constant 0 : index
    %9 = vector.load %arg4[%c0_6, %c0_7] : memref<64x128xbf16, #tpu.memory_space<vmem>>, vector<64x128xbf16>
    tpu.vector_store %arg4[%c0_6, %c0_7], %8 {strides = array<i32>} : memref<64x128xbf16, #tpu.memory_space<vmem>>, vector<64x128xbf16>,
    return
  }
  func.func @transform_0(%arg0: i32) -> (i32, i32) {
    %c0_i32 = arith.constant 0 : i32
    %c0_i32_0 = arith.constant 0 : i32
    return %arg0, %c0_i32 : i32, i32
  }
  func.func @transform_1(%arg0: i32) -> (i32, i32) {
    %c0_i32 = arith.constant 0 : i32
    %c0_i32_0 = arith.constant 0 : i32
    %c0_i32_1 = arith.constant 0 : i32
    return %c0_i32, %c0_i32_0 : i32, i32
  }
  func.func @transform_2(%arg0: i32) -> (i32, i32) {
    %c0_i32 = arith.constant 0 : i32
    %c0_i32_0 = arith.constant 0 : i32
    %c0_i32_1 = arith.constant 0 : i32
    return %c0_i32, %c0_i32_0 : i32, i32
  }
  func.func @transform_3(%arg0: i32) -> (i32, i32) {
    %c0_i32 = arith.constant 0 : i32
    %c0_i32_0 = arith.constant 0 : i32
    return %arg0, %c0_i32 : i32, i32
  }
}

</mosaic_0001>

<bundles_post_ra>
// kernel: conv_bn_act.1
= control target key start
LH: loop header
LB: loop body
LE: loop exit
PB: predicated region body
PF: predicated region fallthrough
CT: control target
= control target key end

     0   :  { %8 = vsyncpa [#allocation3], 0  ;;  %s780_s0 = inlined_call_operand.vmem [shape: bf16[128,36], index: 0, kind: input, shape index: {}]   ;;  %s781_s1 = inlined_call_operand.vmem [shape: bf16[36,128], index: 1, kind: input, shape index: {}]   ;;  %s782_s2 = inlined_call_operand.vmem [shape: f32[1,128], index: 2, kind: input, shape index: {}]   ;;  %s783_s3 = inlined_call_operand.hbm [shape: bf16[128,128], index: 3, kind: output, shape index: {}]  }
   0x1   :  { %10 = vsyncpa [#allocation3 + $0x1], 0  ;;  %s662_s12 = smov 0   ;;  %s664_s13 = smov 0  }
   0x2   :  { %s666_s14 = smov 0   ;;  %s668_s15 = smov 0  }
   0x3 LB: > { %s683_s16 = sadd.s32 4294967295, %s637_s15   ;;  %s434_s17 = sadd.s32 4294967294, %s637_s15   ;;  %s637_s15 = sphi %s668_s15, %s789_s15   ;;  %s633_s14 = sphi %s666_s14, %s788_s14   ;;  %s629_s13 = sphi %s664_s13, %s787_s13   ;;  %s625_s12 = sphi %s662_s12, %s786_s12  }
   0x4   : > { %s687_s18 = sadd.s32 1, %s637_s15   ;;  %s91_s19 = sadd.s32 1, %s633_s14 }
   0x5   : > { %s88_s20 = ssub.s32 %s637_s15, %s687_s18  ;;  %p101_p0 = scmp.ne.s32.totalorder %s633_s14, %s629_s13 }
   0x6   : > { %p89_p1 = scmp.eq.s32.totalorder %s88_s20, 0  ;;  %p102_p2 = scmp.eq.s32.totalorder %s683_s16, 1 }
   0x7   : > { %p107_p3 = scmp.ne.s32.totalorder %s629_s13, %s625_s12  ;;  %p108_p4 = scmp.eq.s32.totalorder %s434_s17, 1 }
   0x8   : > { %s698_s21 = scalar_select %p89_p1, %s633_s14, %s91_s19  }
   0x9   : > { %p700_p5 = por %p102_p2, %p101_p0  ;;  %p704_p6 = por %p108_p4, %p107_p3 }
   0xa   : > { %p437_p7 = scmp.ge.s32.totalorder %s637_s15, 1  ;;  %p141_p8 = scmp.lt.s32.totalorder %s637_s15, 3 }
   0xc   : > { %p142_p9 = pnand %p437_p7, %p141_p8 }
   0xd   : > { %v568_v0 = vld [vmem:[%s781_s1] sm:$0xff] (!%p142_p9)   ;;  %v569_v1 = vld [vmem:[%s781_s1 + $0x8] sm:$0xff] (!%p142_p9)   ;;  %s439_s28 = sshll.u32 (!%p142_p9), %s683_s16, 3  ;;  %v570_v2 = vld [vmem:[%s781_s1 + $0x10] ss:$0 sps:$4 sm:$0x33] (!%p142_p9)  }
   0xe   : > { %145 = sbr.rel (%p142_p9) target bundleno = 262 (0x106), region = 32  ;;  %505 = vmatprep.subr.bf16.mxu0 (!%p142_p9), %v568_v0  ;;  %519 = vmatprep.subr.bf16.mxu1 (!%p142_p9), %v568_v0  ;;  %p166_p10 = scmp.lt.s32.totalorder (!%p142_p9), %s439_s28, 15  ;;  %vm241_vm0 = vcmask (!%p142_p9), 1041408   ;;  %vm228_vm1 = vcmask (!%p142_p9), 293888   ;;  %v441_v8 = vld [vmem:[%s782_s2] ss:$0 sm:$0xff] (!%p142_p9) }
   0xf   : > { %506 = vmatpush3.bf16.msra.mxu0 (!%p142_p9), %v568_v0  ;;  %522 = vmatpush3.bf16.msra.mxu1 (!%p142_p9), %v568_v0  ;;  %v243_v3 = vsel (!%p142_p9), %vm241_vm0, %v570_v2, 0  ;;  %s162_s8 = sand.u32 (!%p142_p9), 1, %s629_s13   ;;  %s474_s20 = sshll.u32 (!%p142_p9), %s683_s16, 9 }
  0x10   : > { %507 = vmatprep.subr.bf16.mxu0 (!%p142_p9), %v569_v1  ;;  %520 = vmatprep.subr.bf16.mxu1 (!%p142_p9), %v569_v1  ;;  %s438_s11 = sshll.u32 (!%p142_p9), %s162_s8, 5  ;;  %s735_s16 = scalar_lea.hbm (!%p142_p9), %s783_s3, %s474_s20 }
  0x11   : > { %s164_s17 = scalar_lea.vmem (!%p142_p9), [#allocation2], %s438_s11  ;;  %s739_s26 = scalar_lea.sflag (!%p142_p9), [#allocation3], %s162_s8 }
  0x12   : > { %s372_s19 = sshll.u32 (!%p142_p9), %s164_s17, 4  ;;  %s730_s19 = int_to_ptr.vmem [resolvable:$true] %s372_s19 }
  0x13   : > { %508 = vmatpush3.bf16.msra.mxu0 (!%p142_p9), %v569_v1  ;;  %523 = vmatpush3.bf16.msra.mxu1 (!%p142_p9), %v569_v1  ;;  %s575_s27 = scalar_lea.vmem (!%p142_p9), %s730_s19, 512 }
  0x14   : > { %525 = vmatprep.subr.msk.bf16.mxu0 (!%p142_p9), %vm241_vm0, %v570_v2  ;;  %526 = vmatprep.subr.msk.bf16.mxu1 (!%p142_p9), %vm241_vm0, %v570_v2  ;;  %p576_p11 = scmp.ne.s32.totalorder (!%p142_p9), %s730_s19, %s575_s27 }
  0x15   : > { %s791_s28 = smov (!%p166_p10, %s439_s28), 15 }
  0x16   : > { %s440_s4 = sshll.u32 %s791_s28, 2  ;;  %p577_p12 = pnand %p576_p11, %p700_p5 }
  0x17   : > { %s169_s7 = scalar_lea.vmem %s780_s0, %s440_s4  ;;  %510 = vmatpush3.bf16.msra.mxu0 %v243_v3  ;;  %524 = vmatpush3.bf16.msra.mxu1 %v243_v3  ;;  %s639_s28 = smov [#allocation2]  }
  0x18   : > { %v571_v4 = vld [vmem:[%s169_s7] sm:$0xff]   ;;  %v572_v5 = vld [vmem:[%s169_s7 + $0x10] sm:$0xff]   ;;  %v573_v6 = vld [vmem:[%s169_s7 + $0x8] sm:$0xff]   ;;  %p578_p13 = pneg %p577_p12  ;;  %s579_s29 = sshll.u32 %s639_s28, 4  ;;  %s580_s29 = int_to_ptr.vmem [resolvable:$false] %s579_s29 }
  0x19   : > { %511 = vmatprep.mubr.msk.bf16.mxu0 %vm228_vm1, %v571_v4  ;;  %v574_v7 = vld [vmem:[%s169_s7 + $0x18] sm:$0xff]   ;;  %515 = vmatprep.mubr.msk.bf16.mxu1 %vm228_vm1, %v572_v5  ;;  %s581_s30 = scalar_lea.vmem %s580_s29, 1024  ;;  %p582_p0 = scmp.lt.s32.totalorder %s730_s19, %s580_s29 }
  0x1a   : > { %512 = vmatmul.mubr.msk.bf16.vlgmr.msra.gmra.mrb[0].mxu0 %vm228_vm1, %v573_v6  ;;  %516 = vmatmul.mubr.msk.bf16.vlgmr.msra.gmra.mrb[0].mxu1 %vm228_vm1, %v574_v7  ;;  %p583_p1 = scmp.lt.s32.totalorder %s581_s30, %s575_s27 }
  0x1c   : > { %p584_p2 = por %p583_p1, %p582_p0 }
  0x1e   : > { %p585_p3 = pnand %p584_p2, %p578_p13 }
  0xed   : > { %v513_v9 = vpop.f32.mrb[0].mxu0  ;;  %v517_v10 = vpop.f32.mrb[0].mxu1 }
  0xee   : > { %v288_v11 = vadd.f32 %v513_v9, %v441_v8  ;;  %v304_v12 = vadd.f32 %v517_v10, %v441_v8  ;;  %v279_v13 = vpop.f32.mrb[1].mxu0  ;;  %v295_v14 = vpop.f32.mrb[1].mxu1 }
  0xef   : > { %v280_v15 = vadd.f32 %v441_v8, %v279_v13  ;;  %v296_v16 = vadd.f32 %v441_v8, %v295_v14  ;;  %v514_v17 = vpop.f32.mrb[2].mxu0  ;;  %v518_v18 = vpop.f32.mrb[2].mxu1 }
  0xf0   : > { %v291_v19 = vadd.f32 %v514_v17, %v441_v8  ;;  %v307_v20 = vadd.f32 %v518_v18, %v441_v8  ;;  %v282_v21 = vpop.f32.mrb[3].mxu0  ;;  %v298_v22 = vpop.f32.mrb[3].mxu1  ;;  %v312_v25 = vmax.f32 %v288_v11, 0.0  ;;  %v316_v26 = vmax.f32 %v304_v12, 0.0 }
  0xf1   : > { %v283_v23 = vadd.f32 %v441_v8, %v282_v21  ;;  %v299_v24 = vadd.f32 %v441_v8, %v298_v22  ;;  %v310_v29 = vmax.f32 %v280_v15, 0.0  ;;  %v314_v30 = vmax.f32 %v296_v16, 0.0 }
  0xf2   : > { %v313_v27 = vmax.f32 %v291_v19, 0.0  ;;  %v317_v28 = vmax.f32 %v307_v20, 0.0 }
  0xf3   : > { %v311_v31 = vmax.f32 %v283_v23, 0.0  ;;  %v315_v32 = vmax.f32 %v299_v24, 0.0 }
  0xf4   : > { %v483_v33 = vpack.c.bf16 %v313_v27, %v312_v25  ;;  %v493_v34 = vpack.c.bf16 %v317_v28, %v316_v26 }
  0xf5   : > { %v478_v35 = vpack.c.bf16 %v311_v31, %v310_v29  ;;  %v488_v36 = vpack.c.bf16 %v315_v32, %v314_v30 }
  0xf6   : > { %495 = vst [vmem:[%s164_s17 + $0x8] sm:$0xff] %v483_v33   ;;  %497 = vst [vmem:[%s164_s17 + $0x18] sm:$0xff] %v493_v34  }
  0xf7   : > { %479 = vst [vmem:[%s164_s17] sm:$0xff] %v478_v35   ;;  %496 = vst [vmem:[%s164_s17 + $0x10] sm:$0xff] %v488_v36  }
  0xf8   : > { %588 = shalt.err (!%p585_p3)
}
  0xf9   : > { %s589_s4 = scalar_lea.hbm %s735_s16, 512  ;;  %s593_s7 = scalar_lea.hbm %s783_s3, 1024 }
  0xfa   : > { %p590_p4 = scmp.ne.s32.totalorder %s735_s16, %s589_s4  ;;  %p594_p9 = scmp.lt.u32.totalorder %s735_s16, %s783_s3 }
  0xfb   : > { %p595_p10 = scmp.lt.u32.totalorder %s593_s7, %s589_s4  ;;  %p597_p12 = scmp.lt.u32.totalorder %s589_s4, %s735_s16 }
  0xfc   : > { %p591_p7 = pnand %p590_p4, %p700_p5 }
  0xfd   : > { %p596_p11 = por %p595_p10, %p594_p9 }
  0xfe   : > { %p592_p8 = pneg %p591_p7 }
  0xff   : > { %p598_p13 = por %p597_p12, %p596_p11 }
 0x101   : > { %p599_p0 = pnand %p598_p13, %p592_p8 }
 0x103   : > { %602 = shalt.err (!%p599_p0)
}
 0x104   : > { %s640_s10 = smov 64   ;;  %s641_s11 = smov 4  }
 0x105   : > { %527 = dma.vmem_to_hbm [thread:$0]  (%p700_p5), %s730_s19, 512, %s735_s16, %s739_s26, %s640_s10, %s640_s10, %s641_s11  }
 0x106 PF: > { %p533_p1 = scmp.ge.s32.totalorder %s637_s15, 2  ;;  %s387_s17 = sand.u32 1, %s625_s12  }
 0x107   : > { %s388_s20 = scalar_lea.sflag [#allocation3], %s387_s17 }
 0x108   : > { %p530_p2 = pnand %p533_p1, %p704_p6 }
 0x10a   : > { %620 = dma.done.wait (!%p530_p2), %s388_s20, 512  }
 0x10b   : > { %622 = vsyncadd (!%p530_p2), %s388_s20, 4294966784  ;;  %p13_p3 = scmp.ge.s32.totalorder %s687_s18, 4   ;;  %s786_s12 = smov %s629_s13 }
 0x10c   : > { %s787_s13 = smov %s633_s14  ;;  %s788_s14 = smov %s698_s21 }
 0x10d   : > { %s789_s15 = smov %s687_s18  ;;  %15 = sbr.rel (!%p13_p3) target bundleno = 3 (0x3), region = 67 }
 0x114   :  { %393 = vsyncpa [#allocation3], 1 }
 0x115   :  { %395 = vsyncpa [#allocation3 + $0x1], 1 }

</bundles_post_ra>
